<compile_context>
chip_gen: v7x
topology: tpu7x:2x2x1
jax: 0.10.0
libtpu: 0.0.40
codegen_flags: <defaults>
</compile_context>

<pallas_src>
import functools

import jax
import jax.numpy as jnp
from jax.experimental import pallas as pl
from jax.experimental.pallas import tpu as pltpu


LANES = 384               # 128 joints * 3 interleaved coords per lane-dense row
BASE_TILE_ROWS = 2048     # rows per grid step for 4-byte dtypes (~15 MiB live VMEM)
VMEM_LIMIT_BYTES = 32 * 1024 * 1024


def _cdiv(a, b):
    return (a + b - 1) // b


def _round_up(x, m):
    return ((x + m - 1) // m) * m


def _detect_num_tensorcores():
    """Best-effort TensorCore count of the local chip (1 on v5e/v6e, 2 on v7x)."""
    try:
        info = pltpu.get_tpu_info()
    except Exception:
        return 1
    for name in ("num_tensorcores", "tensorcore_count", "num_cores", "cores_per_chip"):
        val = getattr(info, name, None)
        if isinstance(val, int) and 1 <= val <= 2:
            return val
    return 1


_NUM_TENSORCORES = _detect_num_tensorcores()


def _mpjpe_kernel(o_ref, g_ref, out_ref, acc_ref, *,
                  k_steps, rows_valid, tile_r, any_partial):
    """Accumulate per-joint L2 norms of one (tile_r, 384) block.

    o_ref, g_ref : (tile_r, LANES) input tiles (native dtype, interleaved xyz)
    out_ref      : (1, 1) SMEM partial-sum output for this partition
    acc_ref      : (tile_r, LANES) f32 VMEM accumulator (resident across k)
    """
    p = pl.program_id(0)
    k = pl.program_id(1)

    @pl.when(k == 0)
    def _():
        acc_ref[...] = jnp.zeros_like(acc_ref)

    d = o_ref[...].astype(jnp.float32) - g_ref[...].astype(jnp.float32)
    sq = d * d                                               # (tile_r, LANES)

    # Lane l gathers sq[l] + sq[l+1] + sq[l+2] (one joint's xyz) via two XLU
    # lane rotations.  Only lanes with l % 3 == 0 hold a whole joint; the
    # other lanes carry finite garbage that is discarded in the finalization,
    # so no per-step lane mask is needed.
    s = sq
    s = s + pltpu.roll(sq, shift=LANES - 1, axis=1)
    s = s + pltpu.roll(sq, shift=LANES - 2, axis=1)
    norms = jnp.sqrt(s)                                      # EUP, all lanes

    if any_partial:
        # Row-validity masking only on the (rare) edge / overflow blocks; the
        # select also shields the accumulator from stale-VMEM NaN/Inf rows.
        base = (p * k_steps + k) * tile_r
        is_edge = base + tile_r > rows_valid

        @pl.when(is_edge)
        def _():
            rid = jax.lax.broadcasted_iota(jnp.int32, (tile_r, LANES), 0)
            acc_ref[...] += jnp.where(base + rid < rows_valid, norms, 0.0)

        @pl.when(jnp.logical_not(is_edge))
        def _():
            acc_ref[...] += norms
    else:
        acc_ref[...] += norms

    @pl.when(k == k_steps - 1)
    def _():
        # Lane selector applied once: keep only the leading xyz lane per joint.
        lane = jax.lax.broadcasted_iota(jnp.int32, (tile_r, LANES), 1)
        out_ref[0, 0] = jnp.sum(jnp.where(lane % 3 == 0, acc_ref[...], 0.0))


@jax.jit
def mpjpe_loss(outs, gts):
    """Pallas equivalent of mpjpe_loss().forward(outs, gts) -> f32 scalar."""
    assert outs.shape == gts.shape
    assert outs.shape[-1] == 3, "last axis must hold the 3 coordinates"

    n_joints = 1
    for s in outs.shape[:-1]:
        n_joints *= s
    total = n_joints * 3

    # Free metadata reshape to the natural interleaved 1-D layout.
    o_flat = outs.reshape(-1)
    g_flat = gts.reshape(-1)

    rows = total // LANES          # full lane-dense rows of 128 joints
    rem = total - rows * LANES     # tail elements (< 384, i.e. < 128 joints)

    # Tail (< 128 joints): plain jnp over a tiny static slice -- no pad, no
    # full-array copy, negligible HBM traffic.
    tail_sum = jnp.float32(0.0)
    if rem:
        start = rows * LANES
        ot = jax.lax.slice(o_flat, (start,), (total,)).astype(jnp.float32).reshape(-1, 3)
        gt = jax.lax.slice(g_flat, (start,), (total,)).astype(jnp.float32).reshape(-1, 3)
        dt = ot - gt
        tail_sum = jnp.sum(jnp.sqrt(jnp.sum(dt * dt, axis=-1)))

    if rows == 0:
        # Fewer than 128 joints total: the jnp tail covers everything.
        return tail_sum / jnp.float32(n_joints)

    if rem == 0:
        # Fully zero-copy: reshape of a contiguous buffer is a bitcast.
        o2 = o_flat.reshape(rows, LANES)
        g2 = g_flat.reshape(rows, LANES)
    else:
        # TODO(synk): XLA may still materialize this prefix slice; a fully
        # zero-copy partial tail would need manual DMA + in-VMEM relayout of
        # the raw 1-D buffer, which costs more than it saves.
        o2 = jax.lax.slice(o_flat, (0,), (rows * LANES,)).reshape(rows, LANES)
        g2 = jax.lax.slice(g_flat, (0,), (rows * LANES,)).reshape(rows, LANES)

    itemsize = jnp.dtype(o2.dtype).itemsize
    packing = max(1, 4 // itemsize)          # 1 for f32, 2 for bf16, 4 for int8/fp8
    sublane_mult = 8 * packing               # sublane packing of the dtype
    tile_cap = BASE_TILE_ROWS * packing      # keep bytes/block roughly constant
    tile_r = min(tile_cap, _round_up(rows, sublane_mult))

    blocks_total = _cdiv(rows, tile_r)
    p_parts = (_NUM_TENSORCORES
               if (_NUM_TENSORCORES > 1 and blocks_total >= _NUM_TENSORCORES)
               else 1)
    k_steps = _cdiv(blocks_total, p_parts)
    any_partial = (p_parts * k_steps * tile_r) > rows

    def in_index_map(p, k):
        # Clamp so trailing programs of the last partition re-read a valid
        # block; their rows are fully masked in-kernel (is_edge path).
        return (jnp.minimum(p * k_steps + k, blocks_total - 1), 0)

    kernel = functools.partial(
        _mpjpe_kernel, k_steps=k_steps, rows_valid=rows, tile_r=tile_r,
        any_partial=any_partial)

    cost = pl.CostEstimate(
        flops=5 * rows * LANES,                              # sub, mul, 2 adds, acc
        transcendentals=p_parts * k_steps * tile_r * LANES,  # one sqrt per lane/step
        bytes_accessed=2 * rows * LANES * itemsize + 4 * p_parts,
    )

    if p_parts > 1:
        # v7x: genuinely shard the leading axis across both TensorCores.
        dims = (pltpu.CORE_PARALLEL, pltpu.ARBITRARY)
    else:
        dims = (pltpu.ARBITRARY, pltpu.ARBITRARY)

    partials = pl.pallas_call(
        kernel,
        out_shape=jax.ShapeDtypeStruct((p_parts, 1), jnp.float32),
        grid_spec=pltpu.PrefetchScalarGridSpec(
            num_scalar_prefetch=0,
            grid=(p_parts, k_steps),
            in_specs=[
                pl.BlockSpec((tile_r, LANES), in_index_map),
                pl.BlockSpec((tile_r, LANES), in_index_map),
            ],
            out_specs=pl.BlockSpec((1, 1), lambda p, k: (p, 0),
                                   memory_space=pltpu.SMEM),
            scratch_shapes=[pltpu.VMEM((tile_r, LANES), jnp.float32)],
        ),
        compiler_params=pltpu.CompilerParams(
            dimension_semantics=dims,
            vmem_limit_bytes=VMEM_LIMIT_BYTES),
        cost_estimate=cost,
    )(o2, g2)

    # TODO(synk): if a VJP is ever attached, guard sqrt at 0 with an epsilon.
    return (jnp.sum(partials) + tail_sum) / jnp.float32(n_joints)


if __name__ == "__main__":
    key = jax.random.PRNGKey(0)
    k1, k2, k3, k4 = jax.random.split(key, 4)

    # 1) Small pose-like shape (H36M-style J=17): exercises the jnp tail path
    #    (total % 384 != 0) and the partial-block row mask.
    B, T, J, C = 2, 8, 17, 3
    outs = jax.random.normal(k1, (B, T, J, C), dtype=jnp.float32)
    gts = jax.random.normal(k2, (B, T, J, C), dtype=jnp.float32)
    loss = mpjpe_loss(outs, gts)
    jax.block_until_ready(loss)
    ref = jnp.mean(jnp.linalg.norm(outs - gts, axis=-1))
    assert jnp.allclose(loss, ref, rtol=1e-5, atol=1e-6), (loss, ref)

    # 2) Larger 384-divisible shape: zero-copy path, 2 grid steps with a
    #    partial edge block, multi-step accumulation + finalize lane mask.
    B2, T2, J2 = 8, 1032, 32   # 264192 joints -> 2064 lane-dense rows, rem == 0
    outs2 = jax.random.normal(k3, (B2, T2, J2, C), dtype=jnp.float32)
    gts2 = jax.random.normal(k4, (B2, T2, J2, C), dtype=jnp.float32)
    loss2 = mpjpe_loss(outs2, gts2)
    jax.block_until_ready(loss2)
    ref2 = jnp.mean(jnp.linalg.norm(outs2 - gts2, axis=-1))
    assert jnp.allclose(loss2, ref2, rtol=1e-4, atol=1e-6), (loss2, ref2)

    print("KERNEL_OK")
</pallas_src>

<mosaic_0001>
module attributes {stable_mosaic.version = 11 : i64} {
  func.func @_mpjpe_kernel(%arg0: i32, %arg1: i32, %arg2: memref<8x384xf32, #tpu.memory_space<vmem>>, %arg3: memref<8x384xf32, #tpu.memory_space<vmem>>, %arg4: memref<1x1xf32, #tpu.memory_space<smem>>, %arg5: memref<8x384xf32, #tpu.memory_space<vmem>>) attributes {dimension_semantics = [#tpu.dimension_semantics<arbitrary>, #tpu.dimension_semantics<arbitrary>], iteration_bounds = array<i64: 1, 1>, scalar_prefetch = 0 : i64, scratch_operands = 1 : i64, tpu.core_type = #tpu.core_type<tc>, window_params = [{transform_indices = @transform_0, window_bounds = array<i64: 8, 384>}, {transform_indices = @transform_1, window_bounds = array<i64: 8, 384>}, {transform_indices = @transform_2, window_bounds = array<i64: 1, 1>}]} {
    %c0_i32 = arith.constant 0 : i32
    %0 = arith.cmpi eq, %arg1, %c0_i32 : i32
    %1 = arith.extui %0 : i1 to i32
    %c0_i32_0 = arith.constant 0 : i32
    %2 = arith.cmpi ne, %1, %c0_i32_0 : i32
    scf.if %2 {
      %cst = arith.constant 0.000000e+00 : f32
      %25 = vector.broadcast %cst : f32 to vector<8x384xf32>
      %c0_9 = arith.constant 0 : index
      %c0_10 = arith.constant 0 : index
      %26 = vector.load %arg5[%c0_9, %c0_10] : memref<8x384xf32, #tpu.memory_space<vmem>>, vector<8x384xf32>
      tpu.vector_store %arg5[%c0_9, %c0_10], %25 {strides = array<i32>} : memref<8x384xf32, #tpu.memory_space<vmem>>, vector<8x384xf32>,
    } else {
    }
    %c0 = arith.constant 0 : index
    %c0_1 = arith.constant 0 : index
    %3 = vector.load %arg2[%c0, %c0_1] : memref<8x384xf32, #tpu.memory_space<vmem>>, vector<8x384xf32>
    %c0_2 = arith.constant 0 : index
    %c0_3 = arith.constant 0 : index
    %4 = vector.load %arg3[%c0_2, %c0_3] : memref<8x384xf32, #tpu.memory_space<vmem>>, vector<8x384xf32>
    %5 = arith.subf %3, %4 : vector<8x384xf32>
    %6 = arith.mulf %5, %5 : vector<8x384xf32>
    %c383_i32 = arith.constant 383 : i32
    %7 = tpu.dynamic_rotate %6 by %c383_i32 dim 1 : vector<8x384xf32>, i32 -> vector<8x384xf32>
    %8 = arith.addf %6, %7 : vector<8x384xf32>
    %c382_i32 = arith.constant 382 : i32
    %9 = tpu.dynamic_rotate %6 by %c382_i32 dim 1 : vector<8x384xf32>, i32 -> vector<8x384xf32>
    %10 = arith.addf %8, %9 : vector<8x384xf32>
    %11 = math.sqrt %10 : vector<8x384xf32>
    %c1_i32 = arith.constant 1 : i32
    %12 = arith.muli %arg0, %c1_i32 : i32
    %13 = arith.addi %12, %arg1 : i32
    %c8_i32 = arith.constant 8 : i32
    %14 = arith.muli %13, %c8_i32 : i32
    %c8_i32_4 = arith.constant 8 : i32
    %15 = arith.addi %14, %c8_i32_4 : i32
    %c2_i32 = arith.constant 2 : i32
    %16 = arith.cmpi sgt, %15, %c2_i32 : i32
    %17 = arith.extui %16 : i1 to i32
    %c0_i32_5 = arith.constant 0 : i32
    %18 = arith.cmpi ne, %17, %c0_i32_5 : i32
    scf.if %18 {
      %25 = tpu.iota {dimensions = array<i32: 0>} : vector<8x384xi32>
      %c0_9 = arith.constant 0 : index
      %c0_10 = arith.constant 0 : index
      %26 = vector.load %arg5[%c0_9, %c0_10] : memref<8x384xf32, #tpu.memory_space<vmem>>, vector<8x384xf32>
      %27 = vector.broadcast %14 : i32 to vector<8x384xi32>
      %28 = arith.addi %27, %25 : vector<8x384xi32>
      %c2_i32_11 = arith.constant 2 : i32
      %29 = vector.broadcast %c2_i32_11 : i32 to vector<8x384xi32>
      %30 = arith.cmpi slt, %28, %29 : vector<8x384xi32>
      %cst = arith.constant 0.000000e+00 : f32
      %31 = vector.broadcast %cst : f32 to vector<8x384xf32>
      %32 = arith.select %30, %11, %31 : vector<8x384xi1>, vector<8x384xf32>
      %33 = arith.addf %26, %32 : vector<8x384xf32>
      %c0_12 = arith.constant 0 : index
      %c0_13 = arith.constant 0 : index
      %34 = vector.load %arg5[%c0_12, %c0_13] : memref<8x384xf32, #tpu.memory_space<vmem>>, vector<8x384xf32>
      tpu.vector_store %arg5[%c0_12, %c0_13], %33 {strides = array<i32>} : memref<8x384xf32, #tpu.memory_space<vmem>>, vector<8x384xf32>,
    } else {
    }
    %true = arith.constant true
    %19 = arith.xori %16, %true : i1
    %20 = arith.extui %19 : i1 to i32
    %c0_i32_6 = arith.constant 0 : i32
    %21 = arith.cmpi ne, %20, %c0_i32_6 : i32
    scf.if %21 {
      %c0_9 = arith.constant 0 : index
      %c0_10 = arith.constant 0 : index
      %25 = vector.load %arg5[%c0_9, %c0_10] : memref<8x384xf32, #tpu.memory_space<vmem>>, vector<8x384xf32>
      %26 = arith.addf %25, %11 : vector<8x384xf32>
      %c0_11 = arith.constant 0 : index
      %c0_12 = arith.constant 0 : index
      %27 = vector.load %arg5[%c0_11, %c0_12] : memref<8x384xf32, #tpu.memory_space<vmem>>, vector<8x384xf32>
      tpu.vector_store %arg5[%c0_11, %c0_12], %26 {strides = array<i32>} : memref<8x384xf32, #tpu.memory_space<vmem>>, vector<8x384xf32>,
    } else {
    }
    %c0_i32_7 = arith.constant 0 : i32
    %22 = arith.cmpi eq, %arg1, %c0_i32_7 : i32
    %23 = arith.extui %22 : i1 to i32
    %c0_i32_8 = arith.constant 0 : i32
    %24 = arith.cmpi ne, %23, %c0_i32_8 : i32
    scf.if %24 {
      %25 = tpu.iota {dimensions = array<i32: 1>} : vector<8x384xi32>
      %c3_i32 = arith.constant 3 : i32
      %c0_i32_9 = arith.constant 0 : i32
      %26 = arith.cmpi eq, %c3_i32, %c0_i32_9 : i32
      %c1_i32_10 = arith.constant 1 : i32
      %27 = arith.select %26, %c1_i32_10, %c3_i32 : i32
      %28 = vector.broadcast %27 : i32 to vector<8x384xi32>
      %29 = arith.remsi %25, %28 : vector<8x384xi32>
      %c0_i32_11 = arith.constant 0 : i32
      %30 = vector.broadcast %c0_i32_11 : i32 to vector<8x384xi32>
      %31 = arith.cmpi ne, %29, %30 : vector<8x384xi32>
      %c0_i32_12 = arith.constant 0 : i32
      %32 = vector.broadcast %c0_i32_12 : i32 to vector<8x384xi32>
      %33 = arith.cmpi slt, %29, %32 : vector<8x384xi32>
      %c0_i32_13 = arith.constant 0 : i32
      %34 = arith.cmpi slt, %27, %c0_i32_13 : i32
      %35 = vector.broadcast %34 : i1 to vector<8x384xi1>
      %36 = vector.broadcast %35 : vector<8x384xi1> to vector<8x384xi1>
      %37 = arith.xori %33, %36 : vector<8x384xi1>
      %38 = arith.andi %37, %31 : vector<8x384xi1>
      %39 = vector.broadcast %27 : i32 to vector<8x384xi32>
      %40 = arith.addi %29, %39 : vector<8x384xi32>
      %41 = arith.select %38, %40, %29 : vector<8x384xi1>, vector<8x384xi32>
      %c0_i32_14 = arith.constant 0 : i32
      %42 = vector.broadcast %c0_i32_14 : i32 to vector<8x384xi32>
      %43 = arith.cmpi eq, %41, %42 : vector<8x384xi32>
      %c0_15 = arith.constant 0 : index
      %c0_16 = arith.constant 0 : index
      %44 = vector.load %arg5[%c0_15, %c0_16] : memref<8x384xf32, #tpu.memory_space<vmem>>, vector<8x384xf32>
      %cst = arith.constant 0.000000e+00 : f32
      %45 = vector.broadcast %cst : f32 to vector<8x384xf32>
      %46 = arith.select %43, %44, %45 : vector<8x384xi1>, vector<8x384xf32>
      %47 = vector.shape_cast %46 : vector<8x384xf32> to vector<1x8x384xf32>
      %cst_17 = arith.constant dense<0.000000e+00> : vector<1xf32>
      %48 = vector.multi_reduction <add>, %47, %cst_17 [1, 2] : vector<1x8x384xf32> to vector<1xf32>
      %49 = vector.shape_cast %48 : vector<1xf32> to vector<1x1x1xf32>
      %50 = vector.extract %49[0, 0, 0] : f32 from vector<1x1x1xf32>
      %c0_18 = arith.constant 0 : index
      %c0_19 = arith.constant 0 : index
      %51 = memref.load %arg4[%c0_18, %c0_19] : memref<1x1xf32, #tpu.memory_space<smem>>
      memref.store %50, %arg4[%c0_18, %c0_19] : memref<1x1xf32, #tpu.memory_space<smem>>
    } else {
    }
    return
  }
  func.func @transform_0(%arg0: i32, %arg1: i32) -> (i32, i32) {
    %c1_i32 = arith.constant 1 : i32
    %0 = arith.muli %arg0, %c1_i32 : i32
    %1 = arith.addi %0, %arg1 : i32
    %c0_i32 = arith.constant 0 : i32
    %2 = arith.minsi %1, %c0_i32 : i32
    %c0_i32_0 = arith.constant 0 : i32
    %c0_i32_1 = arith.constant 0 : i32
    return %2, %c0_i32_0 : i32, i32
  }
  func.func @transform_1(%arg0: i32, %arg1: i32) -> (i32, i32) {
    %c1_i32 = arith.constant 1 : i32
    %0 = arith.muli %arg0, %c1_i32 : i32
    %1 = arith.addi %0, %arg1 : i32
    %c0_i32 = arith.constant 0 : i32
    %2 = arith.minsi %1, %c0_i32 : i32
    %c0_i32_0 = arith.constant 0 : i32
    %c0_i32_1 = arith.constant 0 : i32
    return %2, %c0_i32_0 : i32, i32
  }
  func.func @transform_2(%arg0: i32, %arg1: i32) -> (i32, i32) {
    %c0_i32 = arith.constant 0 : i32
    %c0_i32_0 = arith.constant 0 : i32
    return %arg0, %c0_i32 : i32, i32
  }
}

</mosaic_0001>

<bundles_post_ra>
// kernel: mpjpe_loss.1
= control target key start
LH: loop header
LB: loop body
LE: loop exit
PB: predicated region body
PF: predicated region fallthrough
CT: control target
= control target key end

     0   :  { %v146_v3 = vlaneseq  ;;  %v572_v13 = vmov 1983009808   ;;  %s713_s0 = inlined_call_operand.vmem [shape: f32[2,384], index: 0, kind: input, shape index: {}]   ;;  %s714_s1 = inlined_call_operand.vmem [shape: f32[2,384], index: 1, kind: input, shape index: {}]   ;;  %s715_s2 = inlined_call_operand.hbm [shape: f32[1,1], index: 2, kind: output, shape index: {}]  }
   0x1   :  { %v119_v0 = vld [vmem:[%s713_s0] sm:$0x3f]  ;;  %v120_v1 = vld [vmem:[%s713_s0 + $0x6] sm:$0x3f]  ;;  %v121_v2 = vld [vmem:[%s713_s0 + $0xc] sm:$0x3f]  ;;  %v144_v14 = vunpack.c.l.s4 %v572_v13 }
   0x2   :  { %v122_v4 = vld [vmem:[%s713_s0 + $0x12] sm:$0x3f]  ;;  %v123_v5 = vld [vmem:[%s714_s1] sm:$0x3f]  ;;  %v124_v6 = vld [vmem:[%s714_s1 + $0x6] sm:$0x3f] }
   0x3   :  { %v125_v7 = vld [vmem:[%s714_s1 + $0xc] sm:$0x3f]  ;;  %v126_v8 = vld [vmem:[%s714_s1 + $0x12] sm:$0x3f]  ;;  %v127_v9 = vsub.f32 %v119_v0, %v123_v5  ;;  %v128_v10 = vsub.f32 %v120_v1, %v124_v6  ;;  %v615_v15 = vshrl.u32 %v146_v3, 7 }
   0x4   :  { %v129_v11 = vsub.f32 %v121_v2, %v125_v7  ;;  %v130_v12 = vsub.f32 %v122_v4, %v126_v8 }
   0x5   :  { %7 = vsyncpa [#allocation4], 0  ;;  %v617_v16 = vmul.f32 %v127_v9, %v127_v9  ;;  %v619_v17 = vmul.f32 %v128_v10, %v128_v10  ;;  %v145_v20 = vunpack.c.0.s8 %v144_v14  ;;  %s573_s0 = smov 127   ;;  %s574_s1 = smov 126   ;;  %v640_v33 = vand.u32 127, %v146_v3 }
   0x6   :  { %v621_v18 = vmul.f32 %v129_v11, %v129_v11  ;;  %v623_v19 = vmul.f32 %v130_v12, %v130_v12  ;;  %s560_s28 = scalar_lea.hbm %s715_s2, 16 }
   0x7   :  { %v140_v21 = vcombine.high %v617_v16, %v619_v17  ;;  %v139_v22 = vcombine.low %v617_v16, %v619_v17  ;;  %v632_v24 = vsub.s32 %v145_v20, %v615_v15  ;;  %vm185_vm0 = vcmp.lt.s32.totalorder %v640_v33, 127  ;;  %p561_p0 = scmp.ne.s32.totalorder %s715_s2, %s560_s28  ;;  %p564_p1 = scmp.lt.u32.totalorder %s560_s28, %s715_s2 }
   0x8   :  { %v142_v23 = vcombine.high %v621_v18, %v623_v19  ;;  %v141_v25 = vcombine.low %v621_v18, %v623_v19  ;;  %v443_v37 = vadd.s32 128, %v640_v33  ;;  %v444_v38 = vadd.s32 256, %v640_v33 }
   0x9   :  { %v156_v26 = vrot.slane %v140_v21, %v632_v24  ;;  %v149_v28 = vrot.slane %v139_v22, %v632_v24  ;;  %v646_v42 = vmul.u32.u64.low 2863311531, %v640_v33  ;;  %v647_v43 = vmul.u32.u64.high 2863311531, %v640_v33, %v646_v42  ;;  %p566_p2 = pnand %p564_p1, %p561_p0 }
   0xa   :  { %v170_v27 = vrot.slane %v142_v23, %v632_v24  ;;  %v163_v29 = vrot.slane %v141_v25, %v632_v24  ;;  %vm241_vm1 = vcmp.lt.s32.totalorder %v640_v33, 126 }
   0xb   :  { %v650_v48 = vmul.u32.u64.low 2863311531, %v443_v37  ;;  %v651_v49 = vmul.u32.u64.high 2863311531, %v443_v37, %v650_v48  ;;  %v653_v50 = vmul.u32.u64.low 2863311531, %v444_v38  ;;  %v654_v51 = vmul.u32.u64.high 2863311531, %v444_v38, %v653_v50 }
   0xc   :  { %v173_v30 = vcombine.low %v156_v26, %v170_v27  ;;  %v171_v31 = vcombine.low %v149_v28, %v163_v29  ;;  %v172_v32 = vcombine.high %v149_v28, %v163_v29  ;;  %v451_v4 = vshrl.u32 %v647_v43, 1 }
   0xd   :  { %v462_v12 = vshrl.u32 %v651_v49, 1  ;;  %v473_v23 = vshrl.u32 %v654_v51, 1 }
   0xe   :  { %181 = vrot.lane.b32.xlu1 %v173_v30, %s573_s0  ;;  %177 = vrot.lane.b32.xlu0 %v171_v31, %s573_s0 }
   0xf   :  { %v463_v29 = vmul.u32 3, %v462_v12 }
  0x12   :  { %235 = vrot.lane.b32.xlu1 %v171_v31, %s574_s1  ;;  %179 = vrot.lane.b32.xlu0 %v172_v32, %s573_s0 }
  0x16   :  { %239 = vrot.lane.b32.xlu1 %v173_v30, %s574_s1  ;;  %237 = vrot.lane.b32.xlu0 %v172_v32, %s574_s1  ;;  %v464_v30 = vsub.s32 %v443_v37, %v463_v29 }
  0x18   :  { %vm479_vm3 = vcmp.ne.s32.totalorder %v464_v30, 0  ;;  %vm482_vm6 = vcmp.lt.s32.totalorder %v464_v30, 0 }
  0x80   :  { %v182_v34 = vpop.permute.xlu1 %181  ;;  %v178_v35 = vpop.permute.xlu0 %177 }
  0x81   :  { %v188_v36 = vsel %vm185_vm0, %v182_v34, %v178_v35 }
  0x82   :  { %v194_v39 = vcombine.high %v188_v36, %v188_v36  ;;  %v215_v52 = vrot.slane %v188_v36, %v632_v24 }
  0x84   :  { %v236_v40 = vpop.permute.xlu1 %235  ;;  %v180_v41 = vpop.permute.xlu0 %179  ;;  %v222_v53 = vrot.slane %v194_v39, %v632_v24 }
  0x85   :  { %v186_v44 = vsel %vm185_vm0, %v180_v41, %v182_v34  ;;  %v187_v45 = vsel %vm185_vm0, %v178_v35, %v180_v41  ;;  %v488_v34 = vadd.s32 3, %v464_v30  ;;  %vm680_vm0 = vmand %vm482_vm6, %vm479_vm3  ;;  %vm333_vm3 = vcmp.lt.s32.totalorder %v615_v15, 2 }
  0x86   :  { %v192_v46 = vcombine.low %v187_v45, %v186_v44  ;;  %v193_v47 = vcombine.high %v187_v45, %v186_v44 }
  0x88   :  { %v201_v54 = vrot.slane %v192_v46, %v632_v24  ;;  %v208_v55 = vrot.slane %v193_v47, %v632_v24  ;;  %v240_v56 = vpop.permute.xlu1 %239  ;;  %v238_v57 = vpop.permute.xlu0 %237 }
  0x89   :  { %v244_v58 = vsel %vm241_vm1, %v240_v56, %v236_v40  ;;  %v242_v59 = vsel %vm241_vm1, %v238_v57, %v240_v56  ;;  %v243_v60 = vsel %vm241_vm1, %v236_v40, %v238_v57 }
  0x8a   :  { %v223_v61 = vcombine.low %v201_v54, %v215_v52  ;;  %v224_v62 = vcombine.high %v201_v54, %v215_v52  ;;  %v225_v63 = vcombine.low %v208_v55, %v222_v53  ;;  %v250_v0 = vcombine.high %v244_v58, %v244_v58 }
  0x8b   :  { %v248_v1 = vcombine.low %v243_v60, %v242_v59  ;;  %v249_v2 = vcombine.high %v243_v60, %v242_v59  ;;  %v226_v3 = vcombine.high %v208_v55, %v222_v53  ;;  %v271_v5 = vrot.slane %v244_v58, %v632_v24 }
  0x8c   :  { %v278_v6 = vrot.slane %v250_v0, %v632_v24  ;;  %v231_v9 = vadd.f32 %v223_v61, %v617_v16  ;;  %v232_v10 = vadd.f32 %v224_v62, %v619_v17  ;;  %v233_v11 = vadd.f32 %v225_v63, %v621_v18 }
  0x8d   :  { %v257_v7 = vrot.slane %v248_v1, %v632_v24  ;;  %v264_v8 = vrot.slane %v249_v2, %v632_v24  ;;  %v234_v22 = vadd.f32 %v226_v3, %v623_v19  ;;  %v452_v16 = vmul.u32 3, %v451_v4 }
  0x8e   :  { %v474_v17 = vmul.u32 3, %v473_v23  ;;  %v491_v60 = vsel %vm680_vm0, %v488_v34, %v464_v30 }
  0x8f   :  { %v279_v13 = vcombine.low %v257_v7, %v271_v5  ;;  %v280_v14 = vcombine.high %v257_v7, %v271_v5  ;;  %v281_v20 = vcombine.low %v264_v8, %v278_v6  ;;  %v282_v21 = vcombine.high %v264_v8, %v278_v6 }
  0x90   :  { %v453_v18 = vsub.s32 %v640_v33, %v452_v16  ;;  %v475_v31 = vsub.s32 %v444_v38, %v474_v17 }
  0x91   :  { %v287_v25 = vadd.f32 %v279_v13, %v231_v9  ;;  %v288_v26 = vadd.f32 %v280_v14, %v232_v10  ;;  %v289_v27 = vadd.f32 %v281_v20, %v233_v11  ;;  %v290_v28 = vadd.f32 %v282_v21, %v234_v22 }
  0x92   :  { %vm478_vm2 = vcmp.ne.s32.totalorder %v453_v18, 0  ;;  %vm480_vm4 = vcmp.ne.s32.totalorder %v475_v31, 0  ;;  %vm481_vm5 = vcmp.lt.s32.totalorder %v453_v18, 0  ;;  %vm483_vm7 = vcmp.lt.s32.totalorder %v475_v31, 0 }
  0x93   :  { %552 = vrsqrt.f32 %v287_v25  ;;  %vm293_vm8 = vcmp.eq.f32.partialorder %v287_v25, inf  ;;  %v487_v32 = vadd.s32 3, %v453_v18  ;;  %v489_v35 = vadd.s32 3, %v475_v31  ;;  %vm674_vm14 = vmand %vm481_vm5, %vm478_vm2 }
  0x94   :  { %554 = vrsqrt.f32 %v288_v26  ;;  %vm295_vm9 = vcmp.eq.f32.partialorder %v287_v25, 0.0  ;;  %v296_v40 = vand.u32 2147483648, %v287_v25  ;;  %vm300_vm10 = vcmp.eq.f32.partialorder %v288_v26, inf  ;;  %vm686_vm2 = vmand %vm483_vm7, %vm480_vm4 }
  0x95   :  { %556 = vrsqrt.f32 %v289_v27  ;;  %vm302_vm11 = vcmp.eq.f32.partialorder %v288_v26, 0.0  ;;  %v303_v37 = vand.u32 2147483648, %v288_v26  ;;  %vm307_vm12 = vcmp.eq.f32.partialorder %v289_v27, inf }
  0x96   :  { %558 = vrsqrt.f32 %v290_v28  ;;  %vm309_vm13 = vcmp.eq.f32.partialorder %v289_v27, 0.0  ;;  %v310_v44 = vand.u32 2147483648, %v289_v27  ;;  %vm314_vm15 = vcmp.eq.f32.partialorder %v290_v28, inf }
  0x97   :  { %vm316_vm1 = vcmp.eq.f32.partialorder %v290_v28, 0.0  ;;  %v317_v52 = vand.u32 2147483648, %v290_v28  ;;  %v490_v59 = vsel %vm674_vm14, %v487_v32, %v453_v18  ;;  %v492_v1 = vsel %vm686_vm2, %v489_v35, %v475_v31 }
  0x98   :  { %vm493_vm4 = vcmp.eq.s32.totalorder %v490_v59, 0  ;;  %vm494_vm5 = vcmp.eq.s32.totalorder %v491_v60, 0  ;;  %vm495_vm6 = vcmp.eq.s32.totalorder %v492_v1, 0 }
  0x9d   :  { %v553_v19 = vpop.eup %552 }
  0x9e   :  { %v555_v36 = vpop.eup %554  ;;  %v292_v39 = vmul.f32 %v553_v19, %v287_v25 }
  0x9f   :  { %v557_v41 = vpop.eup %556  ;;  %v299_v33 = vmul.f32 %v555_v36, %v288_v26 }
  0xa0   :  { %v559_v38 = vpop.eup %558  ;;  %v294_v42 = vsel %vm293_vm8, %v287_v25, %v292_v39  ;;  %v306_v43 = vmul.f32 %v557_v41, %v289_v27 }
  0xa1   :  { %v297_v46 = vsel %vm295_vm9, %v296_v40, %v294_v42  ;;  %v301_v47 = vsel %vm300_vm10, %v288_v26, %v299_v33  ;;  %v313_v48 = vmul.f32 %v559_v38, %v290_v28 }
  0xa2   :  { %v304_v50 = vsel %vm302_vm11, %v303_v37, %v301_v47  ;;  %v308_v51 = vsel %vm307_vm12, %v289_v27, %v306_v43 }
  0xa3   :  { %v311_v53 = vsel %vm309_vm13, %v310_v44, %v308_v51  ;;  %v315_v54 = vsel %vm314_vm15, %v290_v28, %v313_v48  ;;  %v338_v55 = vcombine.low %v297_v46, %v304_v50  ;;  %v339_v56 = vcombine.high %v297_v46, %v304_v50 }
  0xa4   :  { %v318_v58 = vsel %vm316_vm1, %v317_v52, %v315_v54 }
  0xa5   :  { %v340_v61 = vcombine.low %v311_v53, %v318_v58  ;;  %v341_v62 = vcombine.high %v311_v53, %v318_v58  ;;  %v348_v63 = vrot.slane %v338_v55, %v632_v24  ;;  %v355_v0 = vrot.slane %v339_v56, %v632_v24 }
  0xa7   :  { %v362_v2 = vrot.slane %v340_v61, %v632_v24  ;;  %v369_v3 = vrot.slane %v341_v62, %v632_v24 }
  0xa9   :  { %v370_v4 = vcombine.low %v348_v63, %v362_v2  ;;  %v371_v5 = vcombine.high %v348_v63, %v362_v2  ;;  %v372_v6 = vcombine.low %v355_v0, %v369_v3 }
  0xab   :  { %v376_v7 = vsel %vm333_vm3, %v370_v4, 0.0  ;;  %v377_v8 = vsel %vm333_vm3, %v371_v5, 0.0  ;;  %v378_v9 = vsel %vm333_vm3, %v372_v6, 0.0 }
  0xac   :  { %v499_v10 = vsel %vm493_vm4, %v376_v7, 0.0  ;;  %v500_v11 = vsel %vm494_vm5, %v377_v8, 0.0  ;;  %v501_v12 = vsel %vm495_vm6, %v378_v9, 0.0 }
  0xad   :  { %v502_v13 = vadd.f32 %v500_v11, %v499_v10 }
  0xaf   :  { %v503_v14 = vadd.f32 %v502_v13, %v501_v12 }
  0xb1   :  { %504 = vadd.xlane.f32.xlu0 %v503_v14 }
 0x13e   :  { %v505_v20 = vpop.xlane.xlu0 %504 }
 0x13f   :  { %v506_v21 = vrot.slane %v505_v20, 4 }
 0x141   :  { %v507_v24 = vadd.f32 %v506_v21, %v505_v20 }
 0x143   :  { %v508_v22 = vrot.slane %v507_v24, 2 }
 0x145   :  { %v509_v15 = vadd.f32 %v508_v22, %v507_v24 }
 0x147   :  { %v510_v23 = vrot.slane %v509_v15, 1 }
 0x149   :  { %v511_v25 = vadd.f32 %v510_v23, %v509_v15 }
 0x14b   :  { %546 = vpush %v511_v25 }
 0x17c   :  { %s547_s25 = spop %546 }
 0x17d   :  { %514 = sst [smem:[#allocation3]] %s547_s25 }
 0x17e   :  { %569 = shalt.err (!%p566_p2)
}
 0x17f   :  { %s575_s5 = smov [#allocation3]  }
 0x180   :  { %522 = dma.smem_to_hbm %s575_s5, 16, %s715_s2, [#allocation4]  }
 0x181   :  { %570 = dma.done.wait [#allocation4], 16  }
 0x182   :  { %571 = vsyncadd [#allocation4], 4294967280 }
 0x183   :  { %526 = sfence }
 0x184   :  { %527 = vsyncpa [#allocation4], 1 }

</bundles_post_ra>
